<compile_context>
chip_gen: v6e
topology: v6e:2x2x1
jax: 0.10.0
libtpu: 0.0.40
codegen_flags: <defaults>
</compile_context>

<pallas_src>
import functools
import math

import jax
import jax.numpy as jnp
from jax.experimental import pallas as pl
from jax.experimental.pallas import tpu as pltpu

LANE = 128
HIDDEN = 256


def _dqn_kernel(x_ref, w1_ref, b1_ref, w2_ref, b2_ref, w3_ref, b3_ref, out_ref,
                *, fc1_is_broadcast):
    x = x_ref[...]                                    # (TB, n_inputs) f32
    w1 = w1_ref[...]
    if fc1_is_broadcast:
        # K == 1: the matmul is just an outer product; do it as a VPU broadcast multiply.
        h1 = x * w1.astype(jnp.float32)               # (TB,1) * (1,H) -> (TB,H)
    else:
        h1 = jnp.dot(x.astype(w1.dtype), w1, preferred_element_type=jnp.float32)
    h1 = jnp.maximum(h1 + b1_ref[...], 0.0)           # bias/ReLU in f32 (v5e-safe)

    w2 = w2_ref[...]
    h2 = jnp.dot(h1.astype(w2.dtype), w2, preferred_element_type=jnp.float32)
    h2 = jnp.maximum(h2 + b2_ref[...], 0.0)

    w3 = w3_ref[...]
    out = jnp.dot(h2.astype(w3.dtype), w3, preferred_element_type=jnp.float32)
    out_ref[...] = (out + b3_ref[...]).astype(out_ref.dtype)
    # TODO(synk): optionally fuse the Q-value consumer (argmax / TD target) here to avoid an
    # extra dispatch + HBM round-trip for the tiny [B, n_actions] result.


def dqn_forward(x, params, *, batch_tile=None):
    w1, b1, w2, b2, w3, b3 = params
    B, n_inputs = x.shape
    n_actions = w3.shape[1]

    # Lane-dense output: pad the action dim up to a multiple of 128 lanes.
    a_pad = max(LANE, -(-n_actions // LANE) * LANE)
    if a_pad != n_actions:
        w3 = jnp.pad(w3, ((0, 0), (0, a_pad - n_actions)))
        b3 = jnp.pad(b3, ((0, 0), (0, a_pad - n_actions)))

    # Batch tiling: sublane-aligned (multiple of 8).  512-row tiles keep the double-buffered
    # x/out tiles + resident weights well under the v7x VMEM budget while giving the pipeline
    # enough work per step at large B.
    if batch_tile is None:
        batch_tile = 512 if B >= 512 else max(8, -(-B // 8) * 8)
    tb = batch_tile
    b_pad = -(-B // tb) * tb
    if b_pad != B:
        x = jnp.pad(x, ((0, b_pad - B), (0, 0)))

    kernel = functools.partial(_dqn_kernel, fc1_is_broadcast=(n_inputs == 1))

    out = pl.pallas_call(
        kernel,
        out_shape=jax.ShapeDtypeStruct((b_pad, a_pad), jnp.float32),
        grid=(b_pad // tb,),
        in_specs=[
            pl.BlockSpec((tb, n_inputs), lambda i: (i, 0)),   # x: batch-tiled
            pl.BlockSpec(w1.shape, lambda i: (0, 0)),         # weights/biases: VMEM-resident
            pl.BlockSpec(b1.shape, lambda i: (0, 0)),
            pl.BlockSpec(w2.shape, lambda i: (0, 0)),
            pl.BlockSpec(b2.shape, lambda i: (0, 0)),
            pl.BlockSpec(w3.shape, lambda i: (0, 0)),
            pl.BlockSpec(b3.shape, lambda i: (0, 0)),
        ],
        out_specs=pl.BlockSpec((tb, a_pad), lambda i: (i, 0)),
        compiler_params=pltpu.CompilerParams(dimension_semantics=("parallel",)),
    )(x, w1, b1, w2, b2, w3, b3)

    return out[:B, :n_actions]


def init_params(key, n_inputs, n_actions, hidden=HIDDEN, weight_dtype=jnp.float32):
    # Deterministic init mimicking PyTorch nn.Linear default: U(-1/sqrt(fan_in), 1/sqrt(fan_in)).
    # Weights may be stored in bf16 (halves w2's HBM fetch); biases stay f32.
    def linear(k, fan_in, fan_out):
        kw, kb = jax.random.split(k)
        bound = 1.0 / math.sqrt(fan_in)
        w = jax.random.uniform(kw, (fan_in, fan_out), jnp.float32, -bound, bound)
        b = jax.random.uniform(kb, (1, fan_out), jnp.float32, -bound, bound)
        return w.astype(weight_dtype), b

    k1, k2, k3 = jax.random.split(key, 3)
    w1, b1 = linear(k1, n_inputs, hidden)
    w2, b2 = linear(k2, hidden, hidden)
    w3, b3 = linear(k3, hidden, n_actions)
    return (w1, b1, w2, b2, w3, b3)


def ref_forward(x, params):
    # Pure-JAX reference with the same dtype handling as the kernel.
    w1, b1, w2, b2, w3, b3 = params
    if x.shape[1] == 1:
        h1 = x * w1.astype(jnp.float32)
    else:
        h1 = jnp.dot(x.astype(w1.dtype), w1, preferred_element_type=jnp.float32)
    h1 = jnp.maximum(h1 + b1, 0.0)
    h2 = jnp.dot(h1.astype(w2.dtype), w2, preferred_element_type=jnp.float32)
    h2 = jnp.maximum(h2 + b2, 0.0)
    return jnp.dot(h2.astype(w3.dtype), w3, preferred_element_type=jnp.float32) + b3


if __name__ == "__main__":
    key = jax.random.PRNGKey(0)
    n_inputs = 1       # BallChasingEnv observation is a single float
    n_actions = 3      # env.action_space
    batch = 8          # small demo batch; wrapper scales to large replay batches via the grid

    kx, kp = jax.random.split(key)
    x = jax.random.uniform(kx, (batch, n_inputs), jnp.float32, -0.1, 0.1)

    # f32 weights: exact match to the PyTorch module's forward semantics.
    params_f32 = init_params(kp, n_inputs, n_actions)
    out = jax.block_until_ready(dqn_forward(x, params_f32))
    ref = ref_forward(x, params_f32)
    assert out.shape == (batch, n_actions)
    assert jnp.allclose(out, ref, atol=1e-5, rtol=1e-5), float(jnp.max(jnp.abs(out - ref)))

    # bf16 weights with f32 accumulation (halves the dominant w2 HBM fetch per call).
    params_bf16 = init_params(kp, n_inputs, n_actions, weight_dtype=jnp.bfloat16)
    out_bf16 = jax.block_until_ready(dqn_forward(x, params_bf16))
    ref_bf16 = ref_forward(x, params_bf16)
    assert out_bf16.shape == (batch, n_actions)
    assert jnp.allclose(out_bf16, ref_bf16, atol=1e-3, rtol=1e-3), \
        float(jnp.max(jnp.abs(out_bf16 - ref_bf16)))

    print("KERNEL_OK")
</pallas_src>

<mosaic_0001>
module attributes {stable_mosaic.version = 11 : i64} {
  func.func @_dqn_kernel(%arg0: i32, %arg1: memref<8x1xf32, #tpu.memory_space<vmem>>, %arg2: memref<1x256xf32, #tpu.memory_space<vmem>>, %arg3: memref<1x256xf32, #tpu.memory_space<vmem>>, %arg4: memref<256x256xf32, #tpu.memory_space<vmem>>, %arg5: memref<1x256xf32, #tpu.memory_space<vmem>>, %arg6: memref<256x128xf32, #tpu.memory_space<vmem>>, %arg7: memref<1x128xf32, #tpu.memory_space<vmem>>, %arg8: memref<8x128xf32, #tpu.memory_space<vmem>>) attributes {dimension_semantics = [#tpu.dimension_semantics<parallel>], iteration_bounds = array<i64: 1>, scalar_prefetch = 0 : i64, scratch_operands = 0 : i64, tpu.core_type = #tpu.core_type<tc>, window_params = [{transform_indices = @transform_0, window_bounds = array<i64: 8, 1>}, {pipeline_mode = #tpu.pipeline_mode<synchronous>, transform_indices = @transform_1, window_bounds = array<i64: 1, 256>}, {pipeline_mode = #tpu.pipeline_mode<synchronous>, transform_indices = @transform_2, window_bounds = array<i64: 1, 256>}, {pipeline_mode = #tpu.pipeline_mode<synchronous>, transform_indices = @transform_3, window_bounds = array<i64: 256, 256>}, {pipeline_mode = #tpu.pipeline_mode<synchronous>, transform_indices = @transform_4, window_bounds = array<i64: 1, 256>}, {pipeline_mode = #tpu.pipeline_mode<synchronous>, transform_indices = @transform_5, window_bounds = array<i64: 256, 128>}, {pipeline_mode = #tpu.pipeline_mode<synchronous>, transform_indices = @transform_6, window_bounds = array<i64: 1, 128>}, {transform_indices = @transform_7, window_bounds = array<i64: 8, 128>}]} {
    %c0 = arith.constant 0 : index
    %c0_0 = arith.constant 0 : index
    %0 = vector.load %arg1[%c0, %c0_0] : memref<8x1xf32, #tpu.memory_space<vmem>>, vector<8x1xf32>
    %c0_1 = arith.constant 0 : index
    %c0_2 = arith.constant 0 : index
    %1 = vector.load %arg2[%c0_1, %c0_2] : memref<1x256xf32, #tpu.memory_space<vmem>>, vector<1x256xf32>
    %2 = vector.broadcast %0 : vector<8x1xf32> to vector<8x256xf32>
    %3 = vector.broadcast %1 : vector<1x256xf32> to vector<8x256xf32>
    %4 = arith.mulf %2, %3 : vector<8x256xf32>
    %c0_3 = arith.constant 0 : index
    %c0_4 = arith.constant 0 : index
    %5 = vector.load %arg3[%c0_3, %c0_4] : memref<1x256xf32, #tpu.memory_space<vmem>>, vector<1x256xf32>
    %6 = vector.broadcast %5 : vector<1x256xf32> to vector<8x256xf32>
    %7 = arith.addf %4, %6 : vector<8x256xf32>
    %cst = arith.constant 0.000000e+00 : f32
    %8 = vector.broadcast %cst : f32 to vector<8x256xf32>
    %9 = arith.maximumf %7, %8 : vector<8x256xf32>
    %c0_5 = arith.constant 0 : index
    %c0_6 = arith.constant 0 : index
    %10 = vector.load %arg4[%c0_5, %c0_6] : memref<256x256xf32, #tpu.memory_space<vmem>>, vector<256x256xf32>
    %cst_7 = arith.constant dense<0.000000e+00> : vector<8x256xf32>
    %11 = tpu.matmul %9, %10, %cst_7 {dimension_numbers = #tpu.dot_dimension_numbers<[1], [0], [0], [1], [0, 0, 1, 1], [], []>} : vector<8x256xf32>, vector<256x256xf32>, vector<8x256xf32> -> vector<8x256xf32>
    %c0_8 = arith.constant 0 : index
    %c0_9 = arith.constant 0 : index
    %12 = vector.load %arg5[%c0_8, %c0_9] : memref<1x256xf32, #tpu.memory_space<vmem>>, vector<1x256xf32>
    %13 = vector.broadcast %12 : vector<1x256xf32> to vector<8x256xf32>
    %14 = arith.addf %11, %13 : vector<8x256xf32>
    %cst_10 = arith.constant 0.000000e+00 : f32
    %15 = vector.broadcast %cst_10 : f32 to vector<8x256xf32>
    %16 = arith.maximumf %14, %15 : vector<8x256xf32>
    %c0_11 = arith.constant 0 : index
    %c0_12 = arith.constant 0 : index
    %17 = vector.load %arg6[%c0_11, %c0_12] : memref<256x128xf32, #tpu.memory_space<vmem>>, vector<256x128xf32>
    %cst_13 = arith.constant dense<0.000000e+00> : vector<8x128xf32>
    %18 = tpu.matmul %16, %17, %cst_13 {dimension_numbers = #tpu.dot_dimension_numbers<[1], [0], [0], [1], [0, 0, 1, 1], [], []>} : vector<8x256xf32>, vector<256x128xf32>, vector<8x128xf32> -> vector<8x128xf32>
    %c0_14 = arith.constant 0 : index
    %c0_15 = arith.constant 0 : index
    %19 = vector.load %arg7[%c0_14, %c0_15] : memref<1x128xf32, #tpu.memory_space<vmem>>, vector<1x128xf32>
    %20 = vector.broadcast %19 : vector<1x128xf32> to vector<8x128xf32>
    %21 = arith.addf %18, %20 : vector<8x128xf32>
    %c0_16 = arith.constant 0 : index
    %c0_17 = arith.constant 0 : index
    %22 = vector.load %arg8[%c0_16, %c0_17] : memref<8x128xf32, #tpu.memory_space<vmem>>, vector<8x128xf32>
    tpu.vector_store %arg8[%c0_16, %c0_17], %21 {strides = array<i32>} : memref<8x128xf32, #tpu.memory_space<vmem>>, vector<8x128xf32>,
    return
  }
  func.func @transform_0(%arg0: i32) -> (i32, i32) {
    %c0_i32 = arith.constant 0 : i32
    %c0_i32_0 = arith.constant 0 : i32
    return %arg0, %c0_i32 : i32, i32
  }
  func.func @transform_1(%arg0: i32) -> (i32, i32) {
    %c0_i32 = arith.constant 0 : i32
    %c0_i32_0 = arith.constant 0 : i32
    %c0_i32_1 = arith.constant 0 : i32
    return %c0_i32, %c0_i32_0 : i32, i32
  }
  func.func @transform_2(%arg0: i32) -> (i32, i32) {
    %c0_i32 = arith.constant 0 : i32
    %c0_i32_0 = arith.constant 0 : i32
    %c0_i32_1 = arith.constant 0 : i32
    return %c0_i32, %c0_i32_0 : i32, i32
  }
  func.func @transform_3(%arg0: i32) -> (i32, i32) {
    %c0_i32 = arith.constant 0 : i32
    %c0_i32_0 = arith.constant 0 : i32
    %c0_i32_1 = arith.constant 0 : i32
    return %c0_i32, %c0_i32_0 : i32, i32
  }
  func.func @transform_4(%arg0: i32) -> (i32, i32) {
    %c0_i32 = arith.constant 0 : i32
    %c0_i32_0 = arith.constant 0 : i32
    %c0_i32_1 = arith.constant 0 : i32
    return %c0_i32, %c0_i32_0 : i32, i32
  }
  func.func @transform_5(%arg0: i32) -> (i32, i32) {
    %c0_i32 = arith.constant 0 : i32
    %c0_i32_0 = arith.constant 0 : i32
    %c0_i32_1 = arith.constant 0 : i32
    return %c0_i32, %c0_i32_0 : i32, i32
  }
  func.func @transform_6(%arg0: i32) -> (i32, i32) {
    %c0_i32 = arith.constant 0 : i32
    %c0_i32_0 = arith.constant 0 : i32
    %c0_i32_1 = arith.constant 0 : i32
    return %c0_i32, %c0_i32_0 : i32, i32
  }
  func.func @transform_7(%arg0: i32) -> (i32, i32) {
    %c0_i32 = arith.constant 0 : i32
    %c0_i32_0 = arith.constant 0 : i32
    return %arg0, %c0_i32 : i32, i32
  }
}

</mosaic_0001>

<bundles_post_ra>
// kernel: tpu_custom_call.1
= control target key start
LH: loop header
LB: loop body
LE: loop exit
PB: predicated region body
PF: predicated region fallthrough
CT: control target
= control target key end

     0   :  { %12 = vsyncpa [#allocation3], 0  ;;  %s549_s0 = inlined_call_operand.vmem [shape: f32[8,1], index: 0, kind: input, shape index: {}]   ;;  %s550_s1 = inlined_call_operand.vmem [shape: f32[1,256], index: 1, kind: input, shape index: {}]   ;;  %s551_s2 = inlined_call_operand.vmem [shape: f32[1,256], index: 2, kind: input, shape index: {}]   ;;  %s552_s3 = inlined_call_operand.hbm [shape: f32[256,256], index: 3, kind: input, shape index: {}]   ;;  %s553_s4 = inlined_call_operand.vmem [shape: f32[1,256], index: 4, kind: input, shape index: {}]   ;;  %s554_s5 = inlined_call_operand.hbm [shape: f32[256,128], index: 5, kind: input, shape index: {}]   ;;  %s555_s6 = inlined_call_operand.vmem [shape: f32[1,128], index: 6, kind: input, shape index: {}]   ;;  %s556_s7 = inlined_call_operand.hbm [shape: f32[8,128], index: 7, kind: output, shape index: {}]  }
   0x1   :  { %13 = vsyncpa [#allocation6], 0 }
   0x2   :  { %14 = vsyncpa [#allocation4], 0  ;;  %s477_s24 = smov [#allocation2]  }
   0x3   :  { %s26_s25 = sshll.u32 %s477_s24, 4  ;;  %s27_s25 = int_to_ptr.vmem [resolvable:$true] %s26_s25 }
   0x4   :  { %s419_s26 = scalar_lea.vmem %s27_s25, 8192  ;;  %p424_p1 = scmp.lt.s32.totalorder %s27_s25, %s27_s25 }
   0x5   :  { %p420_p0 = scmp.ne.s32.totalorder %s27_s25, %s419_s26  ;;  %p425_p2 = scmp.lt.s32.totalorder %s419_s26, %s419_s26 }
   0x7   :  { %p426_p3 = por %p425_p2, %p424_p1 }
   0x9   :  { %p427_p4 = pnand %p426_p3, %p420_p0 }
   0xb   :  { %430 = shalt.err (!%p427_p4)
}
   0xc   :  { %s478_s27 = smov 256   ;;  %s479_s28 = smov 16  }
   0xd   :  { %32 = dma.hbm_to_vmem [thread:$0]  %s552_s3, 8192, %s27_s25, [#allocation3], %s478_s27, %s478_s27, %s479_s28  }
   0xe   :  { %s480_s8 = smov [#allocation5]  }
   0xf   :  { %s40_s9 = sshll.u32 %s480_s8, 4  ;;  %s41_s9 = int_to_ptr.vmem [resolvable:$true] %s40_s9 }
  0x10   :  { %s439_s10 = scalar_lea.vmem %s41_s9, 4096  ;;  %p444_p6 = scmp.lt.s32.totalorder %s41_s9, %s41_s9 }
  0x11   :  { %p440_p5 = scmp.ne.s32.totalorder %s41_s9, %s439_s10  ;;  %p445_p7 = scmp.lt.s32.totalorder %s439_s10, %s439_s10 }
  0x13   :  { %p446_p8 = por %p445_p7, %p444_p6 }
  0x15   :  { %p447_p9 = pnand %p446_p8, %p440_p5 }
  0x17   :  { %450 = shalt.err (!%p447_p9)
}
  0x18   :  { %s481_s11 = smov 128   ;;  %s482_s12 = smov 8  }
  0x19   :  { %46 = dma.hbm_to_vmem [thread:$0]  %s554_s5, 4096, %s41_s9, [#allocation6], %s481_s11, %s481_s11, %s482_s12  }
  0x1a   :  { %471 = dma.done.wait [#allocation3], 8192  }
  0x1b   :  { %472 = vsyncadd [#allocation3], 4294959104 }
  0x1c   :  { %473 = dma.done.wait [#allocation6], 4096  }
  0x1d   :  { %474 = vsyncadd [#allocation6], 4294963200  ;;  %v483_v0 = vmov 0   ;;  %v55_v1 = vld [vmem:[%s549_s0] sm:$0xff]  ;;  %v122_v2 = vld [vmem:[#allocation2 + $0xf8] sm:$0xff]  ;;  %s484_s20 = smov [#allocation7]  }
  0x1e   :  { %410 = vset.pattern.permute.xlu0 %v483_v0  ;;  %v121_v3 = vld [vmem:[#allocation2 + $0xf0] sm:$0xff]  ;;  %167 = vmatprep.subr.mxu0 %v122_v2  ;;  %v120_v4 = vld [vmem:[#allocation2 + $0xe8] sm:$0xff]  ;;  %v119_v5 = vld [vmem:[#allocation2 + $0xe0] sm:$0xff]  ;;  %s356_s21 = sshll.u32 %s484_s20, 4  ;;  %s357_s21 = int_to_ptr.vmem [resolvable:$true] %s356_s21 }
  0x1f   :  { %59 = vperm.xlu0 %410, %v55_v1   ;;  %168 = vmatpush1.msra.mxu0 %v121_v3  ;;  %v118_v6 = vld [vmem:[#allocation2 + $0xd8] sm:$0xff]  ;;  %v117_v7 = vld [vmem:[#allocation2 + $0xd0] sm:$0xff]  ;;  %v116_v8 = vld [vmem:[#allocation2 + $0xc8] sm:$0xff]  ;;  %p456_p11 = scmp.lt.s32.totalorder %s357_s21, %s357_s21 }
  0x20   :  { %169 = vmatprep.subr.mxu0 %v120_v4  ;;  %v115_v9 = vld [vmem:[#allocation2 + $0xc0] sm:$0xff]  ;;  %v114_v10 = vld [vmem:[#allocation2 + $0xb8] sm:$0xff]  ;;  %v113_v11 = vld [vmem:[#allocation2 + $0xb0] sm:$0xff] }
  0x21   :  { %170 = vmatpush1.msra.mxu0 %v119_v5  ;;  %v112_v12 = vld [vmem:[#allocation2 + $0xa8] sm:$0xff]  ;;  %v111_v13 = vld [vmem:[#allocation2 + $0xa0] sm:$0xff]  ;;  %v110_v14 = vld [vmem:[#allocation2 + $0x98] sm:$0xff] }
  0x22   :  { %171 = vmatprep.subr.mxu0 %v118_v6  ;;  %v109_v15 = vld [vmem:[#allocation2 + $0x90] sm:$0xff]  ;;  %v108_v16 = vld [vmem:[#allocation2 + $0x88] sm:$0xff]  ;;  %v107_v17 = vld [vmem:[#allocation2 + $0x80] sm:$0xff] }
  0x23   :  { %172 = vmatpush1.msra.mxu0 %v117_v7  ;;  %v106_v18 = vld [vmem:[#allocation2 + $0x78] sm:$0xff]  ;;  %v105_v19 = vld [vmem:[#allocation2 + $0x70] sm:$0xff]  ;;  %v104_v20 = vld [vmem:[#allocation2 + $0x68] sm:$0xff] }
  0x24   :  { %173 = vmatprep.subr.mxu0 %v116_v8  ;;  %v103_v21 = vld [vmem:[#allocation2 + $0x60] sm:$0xff]  ;;  %v102_v22 = vld [vmem:[#allocation2 + $0x58] sm:$0xff]  ;;  %v101_v23 = vld [vmem:[#allocation2 + $0x50] sm:$0xff] }
  0x25   :  { %174 = vmatpush1.msra.mxu0 %v115_v9  ;;  %v100_v24 = vld [vmem:[#allocation2 + $0x48] sm:$0xff]  ;;  %v99_v25 = vld [vmem:[#allocation2 + $0x40] sm:$0xff]  ;;  %v98_v26 = vld [vmem:[#allocation2 + $0x38] sm:$0xff] }
  0x26   :  { %175 = vmatprep.subr.mxu0 %v114_v10  ;;  %v271_v27 = vld [vmem:[#allocation5 + $0xf8] sm:$0xff]  ;;  %v97_v29 = vld [vmem:[#allocation2 + $0x30] sm:$0xff]  ;;  %v96_v32 = vld [vmem:[#allocation2 + $0x28] sm:$0xff] }
  0x27   :  { %176 = vmatpush1.msra.mxu0 %v113_v11  ;;  %v255_v28 = vld [vmem:[#allocation5 + $0x78] sm:$0xff]  ;;  %367 = vmatprep.subr.mxu1 %v271_v27  ;;  %v270_v30 = vld [vmem:[#allocation5 + $0xf0] sm:$0xff]  ;;  %v269_v33 = vld [vmem:[#allocation5 + $0xe8] sm:$0xff] }
  0x28   :  { %177 = vmatprep.subr.mxu0 %v112_v12  ;;  %v254_v31 = vld [vmem:[#allocation5 + $0x70] sm:$0xff]  ;;  %368 = vmatpush3.msra.mxu1 %v255_v28  ;;  %v95_v34 = vld [vmem:[#allocation2 + $0x20] sm:$0xff]  ;;  %v253_v35 = vld [vmem:[#allocation5 + $0x68] sm:$0xff] }
  0x29   :  { %178 = vmatpush1.msra.mxu0 %v111_v13  ;;  %369 = vmatprep.subr.mxu1 %v270_v30  ;;  %v94_v36 = vld [vmem:[#allocation2 + $0x18] sm:$0xff]  ;;  %v268_v37 = vld [vmem:[#allocation5 + $0xe0] sm:$0xff]  ;;  %v93_v38 = vld [vmem:[#allocation2 + $0x10] sm:$0xff] }
  0x2a   :  { %179 = vmatprep.subr.mxu0 %v110_v14  ;;  %370 = vmatpush3.msra.mxu1 %v254_v31  ;;  %v252_v39 = vld [vmem:[#allocation5 + $0x60] sm:$0xff]  ;;  %v92_v40 = vld [vmem:[#allocation2 + $0x8] sm:$0xff]  ;;  %v267_v41 = vld [vmem:[#allocation5 + $0xd8] sm:$0xff] }
  0x2b   :  { %180 = vmatpush1.msra.mxu0 %v109_v15  ;;  %371 = vmatprep.subr.mxu1 %v269_v33  ;;  %v91_v42 = vld [vmem:[#allocation2] sm:$0xff]  ;;  %v251_v43 = vld [vmem:[#allocation5 + $0x58] sm:$0xff]  ;;  %v266_v45 = vld [vmem:[#allocation5 + $0xd0] sm:$0xff] }
  0x2c   :  { %181 = vmatprep.subr.mxu0 %v108_v16  ;;  %372 = vmatpush3.msra.mxu1 %v253_v35  ;;  %v154_v44 = vld [vmem:[#allocation2 + $0x1f8] sm:$0xff]  ;;  %v153_v46 = vld [vmem:[#allocation2 + $0x1f0] sm:$0xff]  ;;  %v152_v48 = vld [vmem:[#allocation2 + $0x1e8] sm:$0xff] }
  0x2d   :  { %182 = vmatpush1.msra.mxu0 %v107_v17  ;;  %373 = vmatprep.subr.mxu1 %v268_v37  ;;  %v250_v47 = vld [vmem:[#allocation5 + $0x50] sm:$0xff]  ;;  %v265_v49 = vld [vmem:[#allocation5 + $0xc8] sm:$0xff]  ;;  %v151_v50 = vld [vmem:[#allocation2 + $0x1e0] sm:$0xff] }
  0x2e   :  { %183 = vmatprep.subr.mxu0 %v106_v18  ;;  %374 = vmatpush3.msra.mxu1 %v252_v39  ;;  %v249_v51 = vld [vmem:[#allocation5 + $0x48] sm:$0xff]  ;;  %v150_v52 = vld [vmem:[#allocation2 + $0x1d8] sm:$0xff]  ;;  %v264_v53 = vld [vmem:[#allocation5 + $0xc0] sm:$0xff] }
  0x2f   :  { %184 = vmatpush1.msra.mxu0 %v105_v19  ;;  %375 = vmatprep.subr.mxu1 %v267_v41  ;;  %v149_v54 = vld [vmem:[#allocation2 + $0x1d0] sm:$0xff]  ;;  %v248_v55 = vld [vmem:[#allocation5 + $0x40] sm:$0xff]  ;;  %v148_v56 = vld [vmem:[#allocation2 + $0x1c8] sm:$0xff] }
  0x30   :  { %185 = vmatprep.subr.mxu0 %v104_v20  ;;  %376 = vmatpush3.msra.mxu1 %v251_v43  ;;  %v263_v57 = vld [vmem:[#allocation5 + $0xb8] sm:$0xff]  ;;  %v147_v58 = vld [vmem:[#allocation2 + $0x1c0] sm:$0xff]  ;;  %v262_v61 = vld [vmem:[#allocation5 + $0xb0] sm:$0xff] }
  0x31   :  { %186 = vmatpush1.msra.mxu0 %v103_v21  ;;  %377 = vmatprep.subr.mxu1 %v266_v45  ;;  %v247_v59 = vld [vmem:[#allocation5 + $0x38] sm:$0xff]  ;;  %v145_v62 = vld [vmem:[#allocation2 + $0x1b0] sm:$0xff]  ;;  %v144_v0 = vld [vmem:[#allocation2 + $0x1a8] sm:$0xff] }
  0x32   :  { %187 = vmatprep.subr.mxu0 %v102_v22  ;;  %378 = vmatpush3.msra.mxu1 %v250_v47  ;;  %v146_v60 = vld [vmem:[#allocation2 + $0x1b8] sm:$0xff]  ;;  %v246_v63 = vld [vmem:[#allocation5 + $0x30] sm:$0xff]  ;;  %v261_v1 = vld [vmem:[#allocation5 + $0xa8] sm:$0xff] }
  0x33   :  { %188 = vmatpush1.msra.mxu0 %v101_v23  ;;  %379 = vmatprep.subr.mxu1 %v265_v49  ;;  %v143_v2 = vld [vmem:[#allocation2 + $0x1a0] sm:$0xff]  ;;  %v245_v3 = vld [vmem:[#allocation5 + $0x28] sm:$0xff]  ;;  %v142_v4 = vld [vmem:[#allocation2 + $0x198] sm:$0xff] }
  0x34   :  { %189 = vmatprep.subr.mxu0 %v100_v24  ;;  %380 = vmatpush3.msra.mxu1 %v249_v51  ;;  %v260_v5 = vld [vmem:[#allocation5 + $0xa0] sm:$0xff]  ;;  %v141_v6 = vld [vmem:[#allocation2 + $0x190] sm:$0xff]  ;;  %v140_v8 = vld [vmem:[#allocation2 + $0x188] sm:$0xff] }
  0x35   :  { %190 = vmatpush1.msra.mxu0 %v99_v25  ;;  %381 = vmatprep.subr.mxu1 %v264_v53  ;;  %v244_v7 = vld [vmem:[#allocation5 + $0x20] sm:$0xff]  ;;  %v138_v10 = vld [vmem:[#allocation2 + $0x178] sm:$0xff]  ;;  %v137_v11 = vld [vmem:[#allocation2 + $0x170] sm:$0xff] }
  0x36   :  { %191 = vmatprep.subr.mxu0 %v98_v26  ;;  %382 = vmatpush3.msra.mxu1 %v248_v55  ;;  %v139_v9 = vld [vmem:[#allocation2 + $0x180] sm:$0xff]  ;;  %v136_v12 = vld [vmem:[#allocation2 + $0x168] sm:$0xff]  ;;  %v134_v14 = vld [vmem:[#allocation2 + $0x158] sm:$0xff]  ;;  %v63_v26 = vlaneseq }
  0x37   :  { %192 = vmatpush1.msra.mxu0 %v97_v29  ;;  %383 = vmatprep.subr.mxu1 %v263_v57  ;;  %v135_v13 = vld [vmem:[#allocation2 + $0x160] sm:$0xff]  ;;  %v133_v15 = vld [vmem:[#allocation2 + $0x150] sm:$0xff]  ;;  %v132_v16 = vld [vmem:[#allocation2 + $0x148] sm:$0xff] }
  0x38   :  { %193 = vmatprep.subr.mxu0 %v96_v32  ;;  %384 = vmatpush3.msra.mxu1 %v247_v59  ;;  %v131_v17 = vld [vmem:[#allocation2 + $0x140] sm:$0xff]  ;;  %v130_v18 = vld [vmem:[#allocation2 + $0x138] sm:$0xff]  ;;  %v129_v19 = vld [vmem:[#allocation2 + $0x130] sm:$0xff]  ;;  %v64_v27 = vshrl.u32 %v63_v26, 7 }
  0x39   :  { %194 = vmatpush1.msra.mxu0 %v95_v34  ;;  %385 = vmatprep.subr.mxu1 %v262_v61  ;;  %v128_v20 = vld [vmem:[#allocation2 + $0x128] sm:$0xff]  ;;  %v127_v21 = vld [vmem:[#allocation2 + $0x120] sm:$0xff]  ;;  %v126_v22 = vld [vmem:[#allocation2 + $0x118] sm:$0xff] }
  0x3a   :  { %195 = vmatprep.subr.mxu0 %v94_v36  ;;  %386 = vmatpush3.msra.mxu1 %v246_v63  ;;  %v125_v23 = vld [vmem:[#allocation2 + $0x110] sm:$0xff]  ;;  %v124_v24 = vld [vmem:[#allocation2 + $0x108] sm:$0xff]  ;;  %v123_v25 = vld [vmem:[#allocation2 + $0x100] sm:$0xff]  ;;  %v65_v28 = vsub.s32 0, %v64_v27  ;;  %v69_v29 = vsub.s32 1, %v64_v27 }
  0x3b   :  { %196 = vmatpush1.msra.mxu0 %v93_v38  ;;  %387 = vmatprep.subr.mxu1 %v261_v1  ;;  %v56_v30 = vld [vmem:[%s550_s1] sm:$0x3]  ;;  %v259_v43 = vld [vmem:[#allocation5 + $0x98] sm:$0xff]  ;;  %v258_v45 = vld [vmem:[#allocation5 + $0x90] sm:$0xff] }
  0x3c   :  { %197 = vmatprep.subr.mxu0 %v92_v40  ;;  %388 = vmatpush3.msra.mxu1 %v245_v3  ;;  %v75_v31 = vld [vmem:[%s551_s2] sm:$0x3]  ;;  %v66_v32 = vrot.slane %v56_v30, %v65_v28  ;;  %v70_v33 = vrot.slane %v56_v30, %v69_v29  ;;  %v257_v47 = vld [vmem:[#allocation5 + $0x88] sm:$0xff] }
  0x3d   :  { %198 = vmatpush1.msra.mxu0 %v91_v42  ;;  %389 = vmatprep.subr.mxu1 %v260_v5  ;;  %v80_v34 = vrot.slane %v75_v31, %v65_v28  ;;  %v84_v35 = vrot.slane %v75_v31, %v69_v29  ;;  %v256_v49 = vld [vmem:[#allocation5 + $0x80] sm:$0xff] }
  0x3e   :  { %199 = vmatprep.subr.mxu0 %v154_v44  ;;  %390 = vmatpush3.msra.mxu1 %v244_v7  ;;  %v243_v44 = vld [vmem:[#allocation5 + $0x18] sm:$0xff]  ;;  %v155_v51 = vld [vmem:[%s553_s4] sm:$0x3]  ;;  %s451_s4 = scalar_lea.vmem %s357_s21, 128 }
  0x3f   :  { %200 = vmatpush2.msra.mxu0 %v153_v46  ;;  %391 = vmatprep.subr.mxu1 %v259_v43  ;;  %v242_v46 = vld [vmem:[#allocation5 + $0x10] sm:$0xff]  ;;  %v164_v53 = vrot.slane %v155_v51, %v69_v29  ;;  %v366_v61 = vld [vmem:[%s555_s6] ss:$0 sm:$0xff]  ;;  %p452_p10 = scmp.ne.s32.totalorder %s357_s21, %s451_s4  ;;  %p457_p12 = scmp.lt.s32.totalorder %s451_s4, %s451_s4 }
  0x40   :  { %201 = vmatprep.subr.mxu0 %v152_v48  ;;  %392 = vmatpush3.msra.mxu1 %v243_v44  ;;  %v241_v48 = vld [vmem:[#allocation5 + $0x8] sm:$0xff] }
  0x41   :  { %202 = vmatpush2.msra.mxu0 %v151_v50  ;;  %393 = vmatprep.subr.mxu1 %v258_v45  ;;  %v240_v50 = vld [vmem:[#allocation5] sm:$0xff]  ;;  %p458_p13 = por %p457_p12, %p456_p11 }
  0x42   :  { %203 = vmatprep.subr.mxu0 %v150_v52  ;;  %394 = vmatpush3.msra.mxu1 %v242_v46  ;;  %v160_v52 = vrot.slane %v155_v51, %v65_v28 }
  0x43   :  { %204 = vmatpush2.msra.mxu0 %v149_v54  ;;  %395 = vmatprep.subr.mxu1 %v257_v47  ;;  %p459_p0 = pnand %p458_p13, %p452_p10 }
  0x44   :  { %205 = vmatprep.subr.mxu0 %v148_v56  ;;  %396 = vmatpush3.msra.mxu1 %v241_v48 }
  0x45   :  { %206 = vmatpush2.msra.mxu0 %v147_v58  ;;  %397 = vmatprep.subr.mxu1 %v256_v49 }
  0x46   :  { %207 = vmatprep.subr.mxu0 %v146_v60  ;;  %398 = vmatpush3.msra.mxu1 %v240_v50 }
  0x47   :  { %208 = vmatpush2.msra.mxu0 %v145_v62 }
  0x48   :  { %209 = vmatprep.subr.mxu0 %v144_v0 }
  0x49   :  { %210 = vmatpush2.msra.mxu0 %v143_v2 }
  0x4a   :  { %211 = vmatprep.subr.mxu0 %v142_v4 }
  0x4b   :  { %212 = vmatpush2.msra.mxu0 %v141_v6 }
  0x4c   :  { %213 = vmatprep.subr.mxu0 %v140_v8 }
  0x4d   :  { %214 = vmatpush2.msra.mxu0 %v139_v9 }
  0x4e   :  { %215 = vmatprep.subr.mxu0 %v138_v10 }
  0x4f   :  { %216 = vmatpush2.msra.mxu0 %v137_v11 }
  0x50   :  { %217 = vmatprep.subr.mxu0 %v136_v12 }
  0x51   :  { %218 = vmatpush2.msra.mxu0 %v135_v13 }
  0x52   :  { %219 = vmatprep.subr.mxu0 %v134_v14 }
  0x53   :  { %220 = vmatpush2.msra.mxu0 %v133_v15 }
  0x54   :  { %221 = vmatprep.subr.mxu0 %v132_v16 }
  0x55   :  { %222 = vmatpush2.msra.mxu0 %v131_v17 }
  0x56   :  { %223 = vmatprep.subr.mxu0 %v130_v18 }
  0x57   :  { %224 = vmatpush2.msra.mxu0 %v129_v19 }
  0x58   :  { %225 = vmatprep.subr.mxu0 %v128_v20 }
  0x59   :  { %226 = vmatpush2.msra.mxu0 %v127_v21 }
  0x5a   :  { %227 = vmatprep.subr.mxu0 %v126_v22 }
  0x5b   :  { %228 = vmatpush2.msra.mxu0 %v125_v23 }
  0x5c   :  { %229 = vmatprep.subr.mxu0 %v124_v24 }
  0x5d   :  { %230 = vmatpush2.msra.mxu0 %v123_v25 }
  0x9a   :  { %v60_v36 = vpop.permute.xlu0 %59 }
  0x9b   :  { %v73_v37 = vmul.f32 %v66_v32, %v60_v36  ;;  %v74_v38 = vmul.f32 %v70_v33, %v60_v36 }
  0x9d   :  { %v87_v39 = vadd.f32 %v80_v34, %v73_v37  ;;  %v88_v40 = vadd.f32 %v84_v35, %v74_v38 }
  0x9f   :  { %v89_v41 = vmax.f32 %v87_v39, 0.0  ;;  %v90_v42 = vmax.f32 %v88_v40, 0.0 }
  0xa1   :  { %231 = vmatprep.mubr.f32.mxu0 %v90_v42 }
  0xa2   :  { %232 = vmatmul.mubr.f32.vlgmr.msra.gmra.mxu0 %v89_v41 }
 0x162   :  { %v233_v54 = vpop.f32.mrf.mxu0 }
 0x163   :  { %v234_v55 = vadd.f32 %v233_v54, %v160_v52 }
 0x164   :  { %v235_v56 = vpop.f32.mrf.mxu0 }
 0x165   :  { %v236_v57 = vadd.f32 %v235_v56, %v164_v53  ;;  %v238_v59 = vmax.f32 %v234_v55, 0.0 }
 0x167   :  { %v239_v58 = vmax.f32 %v236_v57, 0.0 }
 0x169   :  { %343 = vmatprep.mubr.f32.mxu1 %v239_v58 }
 0x16a   :  { %344 = vmatmul.mubr.f32.vlgmr.msra.gmra.mxu1 %v238_v59 }
 0x22a   :  { %v399_v60 = vpop.f32.mrf.mxu1 }
 0x22c   :  { %v400_v62 = vpop.f32.mrf.mxu1 }
 0x22d   :  { %v401_v63 = vadd.f32 %v400_v62, %v399_v60 }
 0x22f   :  { %v346_v0 = vadd.f32 %v401_v63, %v366_v61 }
 0x231   :  { %349 = vst [vmem:[#allocation7] sm:$0xff] %v346_v0 }
 0x232   :  { %462 = shalt.err (!%p459_p0)
}
 0x233   :  { %359 = dma.vmem_to_hbm [thread:$0]  %s357_s21, 128, %s556_s7, [#allocation4]  }
 0x234   :  { %475 = dma.done.wait [#allocation4], 128  }
 0x235   :  { %476 = vsyncadd [#allocation4], 4294967168 }
 0x236   :  { %363 = vsyncpa [#allocation3], 1 }
 0x237   :  { %364 = vsyncpa [#allocation6], 1 }
 0x238   :  { %365 = vsyncpa [#allocation4], 1 }

</bundles_post_ra>
